<compile_context>
chip_gen: v5e
topology: v5e:2x2
jax: 0.10.0
libtpu: 0.0.40
codegen_flags: <defaults>
</compile_context>

<pallas_src>
import numpy as np
import jax
import jax.numpy as jnp
from jax.experimental import pallas as pl
from jax.experimental.pallas import tpu as pltpu


def _timestep_embedder_kernel(t_ref, freqs_ref, w1_ref, b1_ref, w2_ref, b2_ref, out_ref):
    # t_ref:    (bn, 1)   f32     freqs_ref: (1, F/2) f32
    # w1_ref:   (F, H)    bf16    b1_ref:    (1, H)   f32
    # w2_ref:   (H, H)    bf16    b2_ref:    (1, H)   f32
    # out_ref:  (bn, H)   f32
    half = freqs_ref.shape[1]

    # Sinusoidal embedding in f32 (phase precision matters: t can be ~1000).
    args = t_ref[...] * freqs_ref[...]            # (bn, F/2) via broadcast
    cos_part = jnp.cos(args)                      # (bn, F/2) f32
    sin_part = jnp.sin(args)                      # (bn, F/2) f32

    # Linear1 with the concat folded into a K-split: [cos, sin] @ W1
    #   = cos @ W1[:half] + sin @ W1[half:]   (static ref slices are free).
    h = jnp.dot(cos_part.astype(jnp.bfloat16), w1_ref[:half, :],
                preferred_element_type=jnp.float32)
    h += jnp.dot(sin_part.astype(jnp.bfloat16), w1_ref[half:, :],
                 preferred_element_type=jnp.float32)
    h += b1_ref[...]                              # (bn, H) f32

    # SiLU in f32 (v5e VPU/EUP have no bf16 path; f32 is the fast path everywhere).
    h = h * jax.nn.sigmoid(h)

    # Linear2
    out = jnp.dot(h.astype(jnp.bfloat16), w2_ref[...],
                  preferred_element_type=jnp.float32) + b2_ref[...]
    out_ref[...] = out


def timestep_embedder_forward(t, freqs, w1, b1, w2, b2, *, block_rows=256):
    """t: (N,) float. Weights stored as (in, out). Returns (N, H) f32."""
    n = t.shape[0]
    freq_dim, hidden = w1.shape
    assert freq_dim % 2 == 0, "frequency_embedding_size must be even"
    # TODO(synk): odd frequency_embedding_size (zero-pad last column) is not implemented.

    # Row tile: multiple of 8 sublanes; pad N up so the grid divides evenly.
    bn = min(block_rows, max(8, ((n + 7) // 8) * 8))
    n_pad = ((n + bn - 1) // bn) * bn
    num_tiles = n_pad // bn

    t2d = jnp.zeros((n_pad, 1), jnp.float32).at[:n, 0].set(t.astype(jnp.float32))
    freqs2d = freqs.astype(jnp.float32).reshape(1, -1)
    # Cast weights to bf16 once (host side); biases stay f32.
    w1_bf = w1.astype(jnp.bfloat16)
    w2_bf = w2.astype(jnp.bfloat16)
    b1_2d = b1.astype(jnp.float32).reshape(1, -1)
    b2_2d = b2.astype(jnp.float32).reshape(1, -1)

    cost = pl.CostEstimate(
        flops=2 * n_pad * (freq_dim * hidden + hidden * hidden),
        transcendentals=n_pad * (freq_dim + hidden),
        bytes_accessed=(w1_bf.size * 2 + w2_bf.size * 2
                        + n_pad * hidden * 4 + n_pad * 4),
    )

    out = pl.pallas_call(
        _timestep_embedder_kernel,
        out_shape=jax.ShapeDtypeStruct((n_pad, hidden), jnp.float32),
        grid=(num_tiles,),
        in_specs=[
            pl.BlockSpec((bn, 1), lambda i: (i, 0)),                    # t
            pl.BlockSpec((1, freq_dim // 2), lambda i: (0, 0)),          # freqs
            pl.BlockSpec((freq_dim, hidden), lambda i: (0, 0)),          # w1 (bf16)
            pl.BlockSpec((1, hidden), lambda i: (0, 0)),                 # b1
            pl.BlockSpec((hidden, hidden), lambda i: (0, 0)),            # w2 (bf16)
            pl.BlockSpec((1, hidden), lambda i: (0, 0)),                 # b2
        ],
        out_specs=pl.BlockSpec((bn, hidden), lambda i: (i, 0)),
        compiler_params=pltpu.CompilerParams(dimension_semantics=("parallel",)),
        cost_estimate=cost,
    )(t2d, freqs2d, w1_bf, b1_2d, w2_bf, b2_2d)

    return out[:n]


def make_params(key, frequency_embedding_size, hidden_size):
    """Deterministic synthetic parameters (stand-in for nn.Linear weights)."""
    k1, k2, k3, k4 = jax.random.split(key, 4)
    # Stored as (in, out) — the transpose of PyTorch's (out, in) layout.
    w1 = jax.random.normal(k1, (frequency_embedding_size, hidden_size), jnp.float32) * 0.02
    b1 = jax.random.normal(k2, (hidden_size,), jnp.float32) * 0.02
    w2 = jax.random.normal(k3, (hidden_size, hidden_size), jnp.float32) * 0.02
    b2 = jax.random.normal(k4, (hidden_size,), jnp.float32) * 0.02
    return w1, b1, w2, b2


def make_freqs(frequency_embedding_size, max_period=10000.0):
    half = frequency_embedding_size // 2
    return jnp.exp(
        -np.log(max_period) * jnp.arange(half, dtype=jnp.float32) / half
    )


def reference_forward(t, freqs, w1, b1, w2, b2):
    """Pure-JAX f32 reference mirroring the PyTorch module."""
    args = t.astype(jnp.float32)[:, None] * freqs[None, :]
    emb = jnp.concatenate([jnp.cos(args), jnp.sin(args)], axis=-1)
    h = emb @ w1 + b1
    h = h * jax.nn.sigmoid(h)
    return h @ w2 + b2


if __name__ == "__main__":
    N = 8                       # batch of timesteps
    FREQ_DIM = 256              # frequency_embedding_size (module default)
    HIDDEN = 128                # hidden_size (small, lane-friendly)

    key = jax.random.PRNGKey(0)
    kt, kp = jax.random.split(key)
    t = jax.random.uniform(kt, (N,), jnp.float32, minval=0.0, maxval=1000.0)

    freqs = make_freqs(FREQ_DIM)
    w1, b1, w2, b2 = make_params(kp, FREQ_DIM, HIDDEN)

    out = timestep_embedder_forward(t, freqs, w1, b1, w2, b2)
    out = jax.block_until_ready(out)

    ref = reference_forward(t, freqs, w1, b1, w2, b2)
    # Tolerance loosened vs. pure-f32 because the MXU inputs are bf16 (f32 accumulate).
    np.testing.assert_allclose(np.asarray(out), np.asarray(ref), rtol=5e-2, atol=1e-2)

    print("KERNEL_OK")
</pallas_src>

<mosaic_0001>
module attributes {stable_mosaic.version = 11 : i64} {
  func.func @_timestep_embedder_kernel(%arg0: i32, %arg1: memref<8x1xf32, #tpu.memory_space<vmem>>, %arg2: memref<1x128xf32, #tpu.memory_space<vmem>>, %arg3: memref<256x128xbf16, #tpu.memory_space<vmem>>, %arg4: memref<1x128xf32, #tpu.memory_space<vmem>>, %arg5: memref<128x128xbf16, #tpu.memory_space<vmem>>, %arg6: memref<1x128xf32, #tpu.memory_space<vmem>>, %arg7: memref<8x128xf32, #tpu.memory_space<vmem>>) attributes {dimension_semantics = [#tpu.dimension_semantics<parallel>], iteration_bounds = array<i64: 1>, scalar_prefetch = 0 : i64, scratch_operands = 0 : i64, tpu.core_type = #tpu.core_type<tc>, window_params = [{transform_indices = @transform_0, window_bounds = array<i64: 8, 1>}, {pipeline_mode = #tpu.pipeline_mode<synchronous>, transform_indices = @transform_1, window_bounds = array<i64: 1, 128>}, {pipeline_mode = #tpu.pipeline_mode<synchronous>, transform_indices = @transform_2, window_bounds = array<i64: 256, 128>}, {pipeline_mode = #tpu.pipeline_mode<synchronous>, transform_indices = @transform_3, window_bounds = array<i64: 1, 128>}, {pipeline_mode = #tpu.pipeline_mode<synchronous>, transform_indices = @transform_4, window_bounds = array<i64: 128, 128>}, {pipeline_mode = #tpu.pipeline_mode<synchronous>, transform_indices = @transform_5, window_bounds = array<i64: 1, 128>}, {transform_indices = @transform_6, window_bounds = array<i64: 8, 128>}]} {
    %c0 = arith.constant 0 : index
    %c0_0 = arith.constant 0 : index
    %0 = vector.load %arg1[%c0, %c0_0] : memref<8x1xf32, #tpu.memory_space<vmem>>, vector<8x1xf32>
    %c0_1 = arith.constant 0 : index
    %c0_2 = arith.constant 0 : index
    %1 = vector.load %arg2[%c0_1, %c0_2] : memref<1x128xf32, #tpu.memory_space<vmem>>, vector<1x128xf32>
    %2 = vector.broadcast %0 : vector<8x1xf32> to vector<8x128xf32>
    %3 = vector.broadcast %1 : vector<1x128xf32> to vector<8x128xf32>
    %4 = arith.mulf %2, %3 : vector<8x128xf32>
    %5 = math.cos %4 : vector<8x128xf32>
    %6 = math.sin %4 : vector<8x128xf32>
    %7 = arith.truncf %5 : vector<8x128xf32> to vector<8x128xbf16>
    %c0_3 = arith.constant 0 : index
    %c0_4 = arith.constant 0 : index
    %8 = vector.load %arg3[%c0_3, %c0_4] : memref<256x128xbf16, #tpu.memory_space<vmem>>, vector<128x128xbf16>
    %cst = arith.constant dense<0.000000e+00> : vector<8x128xf32>
    %9 = tpu.matmul %7, %8, %cst {dimension_numbers = #tpu.dot_dimension_numbers<[1], [0], [0], [1], [0, 0, 1, 1], [], []>} : vector<8x128xbf16>, vector<128x128xbf16>, vector<8x128xf32> -> vector<8x128xf32>
    %10 = arith.truncf %6 : vector<8x128xf32> to vector<8x128xbf16>
    %c128 = arith.constant 128 : index
    %c0_5 = arith.constant 0 : index
    %11 = vector.load %arg3[%c128, %c0_5] : memref<256x128xbf16, #tpu.memory_space<vmem>>, vector<128x128xbf16>
    %cst_6 = arith.constant dense<0.000000e+00> : vector<8x128xf32>
    %12 = tpu.matmul %10, %11, %cst_6 {dimension_numbers = #tpu.dot_dimension_numbers<[1], [0], [0], [1], [0, 0, 1, 1], [], []>} : vector<8x128xbf16>, vector<128x128xbf16>, vector<8x128xf32> -> vector<8x128xf32>
    %13 = arith.addf %9, %12 : vector<8x128xf32>
    %c0_7 = arith.constant 0 : index
    %c0_8 = arith.constant 0 : index
    %14 = vector.load %arg4[%c0_7, %c0_8] : memref<1x128xf32, #tpu.memory_space<vmem>>, vector<1x128xf32>
    %15 = vector.broadcast %14 : vector<1x128xf32> to vector<8x128xf32>
    %16 = arith.addf %13, %15 : vector<8x128xf32>
    %17 = arith.negf %16 : vector<8x128xf32>
    %18 = math.exp %17 : vector<8x128xf32>
    %cst_9 = arith.constant 1.000000e+00 : f32
    %19 = vector.broadcast %cst_9 : f32 to vector<8x128xf32>
    %20 = arith.addf %19, %18 : vector<8x128xf32>
    %21 = arith.divf %19, %20 : vector<8x128xf32>
    %22 = arith.mulf %16, %21 : vector<8x128xf32>
    %23 = arith.truncf %22 : vector<8x128xf32> to vector<8x128xbf16>
    %c0_10 = arith.constant 0 : index
    %c0_11 = arith.constant 0 : index
    %24 = vector.load %arg5[%c0_10, %c0_11] : memref<128x128xbf16, #tpu.memory_space<vmem>>, vector<128x128xbf16>
    %cst_12 = arith.constant dense<0.000000e+00> : vector<8x128xf32>
    %25 = tpu.matmul %23, %24, %cst_12 {dimension_numbers = #tpu.dot_dimension_numbers<[1], [0], [0], [1], [0, 0, 1, 1], [], []>} : vector<8x128xbf16>, vector<128x128xbf16>, vector<8x128xf32> -> vector<8x128xf32>
    %c0_13 = arith.constant 0 : index
    %c0_14 = arith.constant 0 : index
    %26 = vector.load %arg6[%c0_13, %c0_14] : memref<1x128xf32, #tpu.memory_space<vmem>>, vector<1x128xf32>
    %27 = vector.broadcast %26 : vector<1x128xf32> to vector<8x128xf32>
    %28 = arith.addf %25, %27 : vector<8x128xf32>
    %c0_15 = arith.constant 0 : index
    %c0_16 = arith.constant 0 : index
    %29 = vector.load %arg7[%c0_15, %c0_16] : memref<8x128xf32, #tpu.memory_space<vmem>>, vector<8x128xf32>
    tpu.vector_store %arg7[%c0_15, %c0_16], %28 {strides = array<i32>} : memref<8x128xf32, #tpu.memory_space<vmem>>, vector<8x128xf32>,
    return
  }
  func.func @transform_0(%arg0: i32) -> (i32, i32) {
    %c0_i32 = arith.constant 0 : i32
    %c0_i32_0 = arith.constant 0 : i32
    return %arg0, %c0_i32 : i32, i32
  }
  func.func @transform_1(%arg0: i32) -> (i32, i32) {
    %c0_i32 = arith.constant 0 : i32
    %c0_i32_0 = arith.constant 0 : i32
    %c0_i32_1 = arith.constant 0 : i32
    return %c0_i32, %c0_i32_0 : i32, i32
  }
  func.func @transform_2(%arg0: i32) -> (i32, i32) {
    %c0_i32 = arith.constant 0 : i32
    %c0_i32_0 = arith.constant 0 : i32
    %c0_i32_1 = arith.constant 0 : i32
    return %c0_i32, %c0_i32_0 : i32, i32
  }
  func.func @transform_3(%arg0: i32) -> (i32, i32) {
    %c0_i32 = arith.constant 0 : i32
    %c0_i32_0 = arith.constant 0 : i32
    %c0_i32_1 = arith.constant 0 : i32
    return %c0_i32, %c0_i32_0 : i32, i32
  }
  func.func @transform_4(%arg0: i32) -> (i32, i32) {
    %c0_i32 = arith.constant 0 : i32
    %c0_i32_0 = arith.constant 0 : i32
    %c0_i32_1 = arith.constant 0 : i32
    return %c0_i32, %c0_i32_0 : i32, i32
  }
  func.func @transform_5(%arg0: i32) -> (i32, i32) {
    %c0_i32 = arith.constant 0 : i32
    %c0_i32_0 = arith.constant 0 : i32
    %c0_i32_1 = arith.constant 0 : i32
    return %c0_i32, %c0_i32_0 : i32, i32
  }
  func.func @transform_6(%arg0: i32) -> (i32, i32) {
    %c0_i32 = arith.constant 0 : i32
    %c0_i32_0 = arith.constant 0 : i32
    return %arg0, %c0_i32 : i32, i32
  }
}

</mosaic_0001>

<bundles_post_ra>
// kernel: tpu_custom_call.1
= control target key start
LH: loop header
LB: loop body
LE: loop exit
PB: predicated region body
PF: predicated region fallthrough
CT: control target
= control target key end

     0   :  { %11 = vsyncpa [#allocation3], 0  ;;  %s1021_s0 = inlined_call_operand.vmem [shape: f32[8,1], index: 0, kind: input, shape index: {}]   ;;  %s1022_s1 = inlined_call_operand.vmem [shape: f32[1,128], index: 1, kind: input, shape index: {}]   ;;  %s1023_s2 = inlined_call_operand.hbm [shape: bf16[256,128], index: 2, kind: input, shape index: {}]   ;;  %s1024_s3 = inlined_call_operand.vmem [shape: f32[1,128], index: 3, kind: input, shape index: {}]   ;;  %s1025_s4 = inlined_call_operand.hbm [shape: bf16[128,128], index: 4, kind: input, shape index: {}]   ;;  %s1026_s5 = inlined_call_operand.vmem [shape: f32[1,128], index: 5, kind: input, shape index: {}]   ;;  %s1027_s6 = inlined_call_operand.hbm [shape: f32[8,128], index: 6, kind: output, shape index: {}]  }
   0x1   :  { %12 = vsyncpa [#allocation6], 0 }
   0x2   :  { %13 = vsyncpa [#allocation4], 0  ;;  %s22_s23 = sshll.u32 %s1023_s2, 4  ;;  %s883_s24 = smov [#allocation2]   ;;  %s23_s23 = int_to_ptr.hbm [resolvable:$true] %s22_s23 }
   0x3   :  { %s24_s25 = sshll.u32 %s883_s24, 4  ;;  %s37_s28 = sshll.u32 %s1025_s4, 4  ;;  %s25_s25 = int_to_ptr.vmem [resolvable:$true] %s24_s25  ;;  %s38_s28 = int_to_ptr.hbm [resolvable:$true] %s37_s28 }
   0x4   :  { %s884_s29 = smov 64   ;;  %s885_s30 = smov 4  }
   0x5   :  { %30 = dma.hbm_to_vmem [thread:$0]  %s23_s23, 2048, %s25_s25, [#allocation3], %s884_s29, %s884_s29, %s885_s30  }
   0x6   :  { %s886_s7 = smov [#allocation5]  }
   0x7   :  { %s39_s8 = sshll.u32 %s886_s7, 4  ;;  %s40_s8 = int_to_ptr.vmem [resolvable:$true] %s39_s8 }
   0x8   :  { %45 = dma.hbm_to_vmem [thread:$0]  %s38_s28, 1024, %s40_s8, [#allocation6], %s884_s29, %s884_s29, %s885_s30  }
   0x9   :  { %877 = dma.done.wait [#allocation3], 2048  }
   0xa   :  { %878 = vsyncadd [#allocation3], 4294965248 }
   0xb   :  { %879 = dma.done.wait [#allocation6], 1024  }
   0xc   :  { %880 = vsyncadd [#allocation6], 4294966272  ;;  %v887_v0 = vmov 0   ;;  %v56_v1 = vld [vmem:[%s1021_s0] sm:$0xff]  ;;  %v776_v3 = vld [vmem:[#allocation2 + $0x78] sm:$0xff]  ;;  %s894_s12 = smov [#allocation7]  }
   0xd   :  { %797 = vset.pattern.permute.xlu0 %v887_v0  ;;  %v798_v2 = vld [vmem:[%s1022_s1] ss:$0 sm:$0xff]  ;;  %v768_v4 = vld [vmem:[#allocation2 + $0x38] sm:$0xff]  ;;  %458 = vmatpush.bf16.msra.mxu0 %v776_v3  ;;  %v775_v7 = vld [vmem:[#allocation2 + $0x70] sm:$0xff]  ;;  %v888_v26 = vmov 683565275  }
   0xe   :  { %60 = vperm.xlu0 %797, %v56_v1   ;;  %519 = vmatpush.bf16.msra.mxu1 %v768_v4  ;;  %v767_v8 = vld [vmem:[#allocation2 + $0x30] sm:$0xff]  ;;  %v774_v11 = vld [vmem:[#allocation2 + $0x68] sm:$0xff]  ;;  %v773_v16 = vld [vmem:[#allocation2 + $0x60] sm:$0xff]  ;;  %v889_v28 = vmov 2475754826   ;;  %s645_s13 = sshll.u32 %s894_s12, 4  ;;  %s646_s13 = int_to_ptr.vmem [resolvable:$true] %s645_s13 }
   0xf   :  { %v766_v12 = vld [vmem:[#allocation2 + $0x28] sm:$0xff]  ;;  %v765_v17 = vld [vmem:[#allocation2 + $0x20] sm:$0xff]  ;;  %v772_v21 = vld [vmem:[#allocation2 + $0x58] sm:$0xff]  ;;  %v890_v31 = vmov 2131351028   ;;  %s647_s16 = sshll.u32 %s1027_s6, 4  ;;  %s648_s16 = int_to_ptr.hbm [resolvable:$true] %s647_s16 }
  0x10   :  { %v764_v22 = vld [vmem:[#allocation2 + $0x18] sm:$0xff]  ;;  %v891_v34 = vmov 2102212464   ;;  %v771_v36 = vld [vmem:[#allocation2 + $0x50] sm:$0xff]  ;;  %v892_v38 = vmov 920167782  }
  0x11   :  { %459 = vmatpush.bf16.msra.mxu0 %v775_v7  ;;  %v893_v41 = vmov 1326507024   ;;  %v763_v43 = vld [vmem:[#allocation2 + $0x10] sm:$0xff]  ;;  %v770_v52 = vld [vmem:[#allocation2 + $0x48] sm:$0xff]  ;;  %v761_v4 = vld [vmem:[#allocation2] sm:$0xff] }
  0x12   :  { %520 = vmatpush.bf16.msra.mxu1 %v767_v8  ;;  %v762_v55 = vld [vmem:[#allocation2 + $0x8] sm:$0xff] }
  0x15   :  { %460 = vmatpush.bf16.msra.mxu0 %v774_v11 }
  0x16   :  { %521 = vmatpush.bf16.msra.mxu1 %v766_v12 }
  0x19   :  { %461 = vmatpush.bf16.msra.mxu0 %v773_v16 }
  0x1a   :  { %522 = vmatpush.bf16.msra.mxu1 %v765_v17 }
  0x1d   :  { %462 = vmatpush.bf16.msra.mxu0 %v772_v21 }
  0x1e   :  { %523 = vmatpush.bf16.msra.mxu1 %v764_v22 }
  0x21   :  { %463 = vmatpush.bf16.msra.mxu0 %v771_v36 }
  0x22   :  { %524 = vmatpush.bf16.msra.mxu1 %v763_v43 }
  0x25   :  { %464 = vmatpush.bf16.msra.mxu0 %v770_v52 }
  0x26   :  { %525 = vmatpush.bf16.msra.mxu1 %v762_v55 }
  0x2a   :  { %526 = vmatpush.bf16.msra.mxu1 %v761_v4 }
  0x80   :  { %v61_v5 = vpop.permute.xlu0 %60 }
  0x81   :  { %v943_v6 = vmul.f32 %v798_v2, %v61_v5  ;;  %v769_v2 = vld [vmem:[#allocation2 + $0x40] sm:$0xff] }
  0x82   :  { %465 = vmatpush.bf16.msra.mxu0 %v769_v2 }
  0x83   :  { %v70_v9 = vand.u32 2139095040, %v943_v6  ;;  %v67_v14 = vand.u32 2147483647, %v943_v6  ;;  %vm69_vm12 = vcmp.lt.s32.totalorder %v943_v6, 0 }
  0x85   :  { %v71_v10 = vshrl.u32 %v70_v9, 23  ;;  %v74_v18 = vand.u32 8388607, %v67_v14  ;;  %vm68_vm13 = vcmp.le.f32.partialorder %v67_v14, 0.7853982 }
  0x87   :  { %v658_v13 = vadd.s32 4294967169, %v71_v10  ;;  %v75_v24 = vor.u32 8388608, %v74_v18 }
  0x89   :  { %v77_v15 = vadd.s32 1, %v658_v13  ;;  %v964_v49 = vshll.u32 %v75_v24, 8 }
  0x8b   :  { %vm78_vm0 = vcmp.gt.s32.totalorder %v77_v15, 0  ;;  %v116_v60 = vand.u32 65535, %v964_v49  ;;  %v117_v3 = vshrl.u32 %v964_v49, 16 }
  0x8c   :  { %v79_v19 = vsel %vm78_vm0, %v77_v15, 0 }
  0x8d   :  { %v81_v20 = vand.u32 31, %v79_v19  ;;  %v951_v25 = vshrl.u32 %v79_v19, 5 }
  0x8f   :  { %v949_v23 = vsub.s32 32, %v81_v20  ;;  %v84_v27 = vshll.u32 %v888_v26, %v81_v20  ;;  %v87_v29 = vshll.u32 %v889_v28, %v81_v20  ;;  %v90_v33 = vshll.u32 %v890_v31, %v81_v20 }
  0x90   :  { %v93_v37 = vshll.u32 %v891_v34, %v81_v20  ;;  %v96_v40 = vshll.u32 %v892_v38, %v81_v20  ;;  %vm99_vm1 = vcmp.lt.s32.totalorder %v951_v25, 1  ;;  %vm102_vm2 = vcmp.lt.s32.totalorder %v951_v25, 4 }
  0x91   :  { %v85_v30 = vshrl.u32 %v889_v28, %v949_v23  ;;  %v88_v32 = vshrl.u32 %v890_v31, %v949_v23  ;;  %v91_v35 = vshrl.u32 %v891_v34, %v949_v23  ;;  %v94_v39 = vshrl.u32 %v892_v38, %v949_v23 }
  0x92   :  { %v97_v42 = vshrl.u32 %v893_v41, %v949_v23  ;;  %vm101_vm3 = vcmp.lt.s32.totalorder %v951_v25, 3  ;;  %vm100_vm4 = vcmp.lt.s32.totalorder %v951_v25, 2 }
  0x93   :  { %v959_v44 = vor.u32 %v85_v30, %v84_v27  ;;  %v961_v45 = vor.u32 %v88_v32, %v87_v29  ;;  %v92_v46 = vor.u32 %v91_v35, %v90_v33  ;;  %v95_v47 = vor.u32 %v94_v39, %v93_v37 }
  0x94   :  { %v98_v48 = vor.u32 %v97_v42, %v96_v40  ;;  %v83_v29 = vshrl.u32 %v888_v26, %v949_v23 }
  0x95   :  { %v107_v50 = vsel %vm99_vm1, %v959_v44, %v961_v45  ;;  %v111_v51 = vsel %vm99_vm1, %v961_v45, %v92_v46  ;;  %v108_v53 = vsel %vm102_vm2, %v95_v47, 920167782  ;;  %v104_v21 = vsel %vm102_vm2, %v92_v46, 2102212464 }
  0x96   :  { %v112_v54 = vsel %vm102_vm2, %v98_v48, 1326507024  ;;  %v109_v56 = vsel %vm101_vm3, %v92_v46, %v108_v53  ;;  %v103_v36 = vsel %vm99_vm1, %v83_v29, %v959_v44  ;;  %v105_v37 = vsel %vm101_vm3, %v961_v45, %v104_v21 }
  0x97   :  { %v113_v57 = vsel %vm101_vm3, %v95_v47, %v112_v54  ;;  %v110_v58 = vsel %vm100_vm4, %v107_v50, %v109_v56  ;;  %v106_v26 = vsel %vm100_vm4, %v103_v36, %v105_v37 }
  0x98   :  { %v114_v59 = vsel %vm100_vm4, %v111_v51, %v113_v57  ;;  %v140_v63 = vand.u32 65535, %v110_v58  ;;  %v141_v1 = vshrl.u32 %v110_v58, 16  ;;  %v160_v46 = vmul.u32 %v964_v49, %v106_v26 }
  0x99   :  { %v118_v61 = vand.u32 65535, %v114_v59  ;;  %v119_v62 = vshrl.u32 %v114_v59, 16  ;;  %vm210_vm4 = vweird.f32 %v943_v6 }
  0x9a   :  { %v143_v7 = vmul.u32 %v141_v1, %v116_v60  ;;  %v144_v9 = vmul.u32 %v140_v63, %v117_v3  ;;  %v142_v12 = vmul.u32 %v140_v63, %v116_v60  ;;  %v145_v16 = vmul.u32 %v141_v1, %v117_v3 }
  0x9b   :  { %v121_v5 = vmul.u32 %v119_v62, %v116_v60  ;;  %v122_v8 = vmul.u32 %v118_v61, %v117_v3  ;;  %v120_v10 = vmul.u32 %v118_v61, %v116_v60  ;;  %v123_v15 = vmul.u32 %v119_v62, %v117_v3 }
  0x9c   :  { %v146_v13 = vshll.u32 %v143_v7, 16  ;;  %v148_v18 = vshll.u32 %v144_v9, 16  ;;  %v147_v34 = vshrl.u32 %v143_v7, 16  ;;  %v149_v40 = vshrl.u32 %v144_v9, 16 }
  0x9d   :  { %v124_v11 = vshll.u32 %v121_v5, 16  ;;  %v126_v17 = vshll.u32 %v122_v8, 16  ;;  %v125_v32 = vshrl.u32 %v121_v5, 16  ;;  %v127_v38 = vshrl.u32 %v122_v8, 16 }
  0x9e   :  { %vm150_vm6 = vc.u32 %v142_v12, %v146_v13  ;;  %v152_v20 = vadd.s32 %v146_v13, %v142_v12 }
  0x9f   :  { %vm128_vm5 = vc.u32 %v120_v10, %v124_v11  ;;  %v130_v19 = vadd.s32 %v124_v11, %v120_v10  ;;  %v151_v24 = vsel %vm150_vm6, 1, %v887_v0 }
  0xa0   :  { %v129_v22 = vsel %vm128_vm5, 1, %v887_v0  ;;  %v153_v28 = vadd.s32 %v151_v24, %v145_v16  ;;  %vm154_vm8 = vc.u32 %v152_v20, %v148_v18  ;;  %v156_v41 = vadd.s32 %v152_v20, %v148_v18 }
  0xa1   :  { %v131_v27 = vadd.s32 %v129_v22, %v123_v15  ;;  %vm132_vm7 = vc.u32 %v130_v19, %v126_v17  ;;  %v155_v31 = vsel %vm154_vm8, 1, %v887_v0 }
  0xa2   :  { %v133_v30 = vsel %vm132_vm7, 1, %v887_v0  ;;  %v157_v35 = vadd.s32 %v155_v31, %v153_v28 }
  0xa3   :  { %v135_v33 = vadd.s32 %v133_v30, %v131_v27 }
  0xa4   :  { %v158_v23 = vadd.s32 %v157_v35, %v147_v34 }
  0xa5   :  { %v136_v39 = vadd.s32 %v135_v33, %v125_v32 }
  0xa6   :  { %v159_v42 = vadd.s32 %v158_v23, %v149_v40 }
  0xa7   :  { %v137_v0 = vadd.s32 %v136_v39, %v127_v38 }
  0xa8   :  { %v163_v43 = vadd.s32 1, %v159_v42 }
  0xa9   :  { %vm162_vm9 = vc.u32 %v137_v0, %v156_v41  ;;  %v161_v56 = vadd.s32 %v156_v41, %v137_v0  ;;  %v784_v0 = vld [vmem:[#allocation5 + $0x38] sm:$0xff]  ;;  %v783_v41 = vld [vmem:[#allocation5 + $0x30] sm:$0xff] }
  0xaa   :  { %v164_v47 = vsel %vm162_vm9, %v163_v43, %v159_v42  ;;  %626 = vmatpush.bf16.msra.mxu2 %v784_v0  ;;  %v782_v42 = vld [vmem:[#allocation5 + $0x28] sm:$0xff]  ;;  %v781_v43 = vld [vmem:[#allocation5 + $0x20] sm:$0xff] }
  0xab   :  { %v165_v44 = vadd.s32 %v164_v47, %v160_v46  ;;  %v780_v46 = vld [vmem:[#allocation5 + $0x18] sm:$0xff]  ;;  %v779_v47 = vld [vmem:[#allocation5 + $0x10] sm:$0xff] }
  0xad   :  { %v166_v48 = vadd.s32 536870912, %v165_v44 }
  0xae   :  { %627 = vmatpush.bf16.msra.mxu2 %v783_v41 }
  0xaf   :  { %v167_v50 = vshrl.u32 %v166_v48, 30 }
  0xb1   :  { %v168_v51 = vshll.u32 %v167_v50, 30  ;;  %v191_v7 = vsub.s32 4, %v167_v50 }
  0xb2   :  { %628 = vmatpush.bf16.msra.mxu2 %v782_v42 }
  0xb3   :  { %v169_v45 = vsub.s32 %v165_v44, %v168_v51  ;;  %v192_v12 = vsel %vm69_vm12, %v191_v7, %v167_v50  ;;  %v799_v44 = vld [vmem:[%s1024_s3] ss:$0 sm:$0xff] }
  0xb4   :  { %v194_v16 = vsel %vm68_vm13, 0, %v192_v12  ;;  %v777_v51 = vld [vmem:[#allocation5] sm:$0xff] }
  0xb5   :  { %vm170_vm10 = vcmp.lt.s32.totalorder %v169_v45, 0  ;;  %v171_v52 = vsub.s32 0, %v169_v45  ;;  %v365_v21 = vadd.s32 3, %v194_v16  ;;  %v211_v28 = vand.u32 3, %v194_v16 }
  0xb6   :  { %629 = vmatpush.bf16.msra.mxu2 %v781_v43 }
  0xb7   :  { %v172_v53 = vsel %vm170_vm10, %v171_v52, %v169_v45  ;;  %v366_v29 = vand.u32 3, %v365_v21  ;;  %vm212_vm14 = vcmp.lt.s32.totalorder %v211_v28, 2  ;;  %vm213_vm15 = vcmp.eq.s32.totalorder %v211_v28, 0 }
  0xb8   :  { %v173_v54 = vclz %v172_v53  ;;  %vm216_vm3 = vcmp.eq.s32.totalorder %v211_v28, 2 }
  0xb9   :  { %vm367_vm0 = vcmp.lt.s32.totalorder %v366_v29, 2  ;;  %vm368_vm1 = vcmp.eq.s32.totalorder %v366_v29, 0  ;;  %vm371_vm2 = vcmp.eq.s32.totalorder %v366_v29, 2 }
  0xba   :  { %v659_v55 = vadd.s32 4294967294, %v173_v54  ;;  %630 = vmatpush.bf16.msra.mxu2 %v780_v46 }
  0xbc   :  { %vm660_vm11 = vcmp.lt.s32.totalorder %v659_v55, 0 }
  0xbd   :  { %v176_v25 = vsel %vm660_vm11, 0, %v659_v55 }
  0xbe   :  { %v177_v57 = vsub.s32 32, %v176_v25  ;;  %v181_v58 = vsub.s32 4294967266, %v176_v25  ;;  %v178_v59 = vshll.u32 %v169_v45, %v176_v25  ;;  %631 = vmatpush.bf16.msra.mxu2 %v779_v47 }
  0xc0   :  { %v179_v60 = vshrl.u32 %v161_v56, %v177_v57  ;;  %v182_v61 = vadd.s32 127, %v181_v58 }
  0xc2   :  { %v180_v49 = vor.u32 %v179_v60, %v178_v59  ;;  %v183_v62 = vshll.u32 %v182_v61, 23 }
  0xc4   :  { %v184_v63 = vor.u32 4788187, %v183_v62  ;;  %v187_v2 = vcvt.s32.f32 %v180_v49 }
  0xc6   :  { %v185_v1 = vand.u32 2147483647, %v184_v63 }
  0xc8   :  { %v188_v3 = vmul.f32 %v187_v2, %v185_v1 }
  0xca   :  { %v189_v4 = vxor.u32 2147483648, %v188_v3 }
  0xcc   :  { %v190_v5 = vsel %vm69_vm12, %v189_v4, %v188_v3 }
  0xcd   :  { %v193_v8 = vsel %vm68_vm13, %v943_v6, %v190_v5  ;;  %v778_v6 = vld [vmem:[#allocation5 + $0x8] sm:$0xff]  ;;  %v800_v5 = vld [vmem:[%s1026_s5] ss:$0 sm:$0xff] }
  0xce   :  { %v195_v9 = vmul.f32 %v193_v8, %v193_v8  ;;  %632 = vmatpush.bf16.msra.mxu2 %v778_v6 }
  0xd0   :  { %v196_v10 = vmul.f32 -0.001358992, %v195_v9  ;;  %v203_v11 = vmul.f32 -0.00019511016, %v195_v9 }
  0xd2   :  { %v197_v13 = vadd.f32 0.041655596, %v196_v10  ;;  %v204_v15 = vadd.f32 0.008332121, %v203_v11  ;;  %633 = vmatpush.bf16.msra.mxu2 %v777_v51 }
  0xd4   :  { %v198_v17 = vmul.f32 %v197_v13, %v195_v9  ;;  %v205_v18 = vmul.f32 %v204_v15, %v195_v9 }
  0xd6   :  { %v199_v19 = vadd.f32 -0.4999988, %v198_v17  ;;  %v206_v20 = vadd.f32 -0.16666654, %v205_v18 }
  0xd8   :  { %v200_v22 = vmul.f32 %v199_v19, %v195_v9  ;;  %v207_v24 = vmul.f32 %v206_v20, %v195_v9 }
  0xda   :  { %v201_v27 = vadd.f32 1.0, %v200_v22  ;;  %v208_v14 = vadd.f32 1.0, %v207_v24 }
  0xdc   :  { %v209_v30 = vmul.f32 %v208_v14, %v193_v8  ;;  %v217_v31 = vxor.u32 2147483648, %v201_v27 }
  0xde   :  { %v214_v32 = vxor.u32 2147483648, %v209_v30  ;;  %v373_v34 = vsel %vm371_vm2, %v217_v31, %v209_v30  ;;  %v218_v36 = vsel %vm216_vm3, %v217_v31, %v209_v30 }
  0xe0   :  { %v370_v33 = vsel %vm368_vm1, %v201_v27, %v214_v32  ;;  %v215_v35 = vsel %vm213_vm15, %v201_v27, %v214_v32 }
  0xe1   :  { %v374_v37 = vsel %vm367_vm0, %v370_v33, %v373_v34  ;;  %v219_v38 = vsel %vm212_vm14, %v215_v35, %v218_v36 }
  0xe2   :  { %v375_v39 = vsel %vm210_vm4, nan, %v374_v37  ;;  %v220_v40 = vsel %vm210_vm4, nan, %v219_v38 }
  0xe3   :  { %v393_v23 = vpack.c.bf16 %v375_v39, %v375_v39  ;;  %v376_v26 = vpack.c.bf16 %v220_v40, %v220_v40 }
  0xe5   :  { %466 = vmatmul.bf16.vlgmr.msra.gmra.mxu0 %v393_v23  ;;  %527 = vmatmul.bf16.vlgmr.msra.gmra.mxu1 %v376_v26 }
 0x162   :  { %v467_v48 = vpop.f32.mrf.mxu0  ;;  %v528_v50 = vpop.f32.mrf.mxu1 }
 0x163   :  { %v529_v45 = vadd.f32 %v528_v50, %v467_v48 }
 0x165   :  { %v536_v52 = vadd.f32 %v799_v44, %v529_v45 }
 0x167   :  { %v728_v53 = vmul.f32 -1.442695, %v536_v52 }
 0x169   :  { %801 = vpow2.f32 %v728_v53 }
 0x16a   :  { %v469_v54 = vpop.f32.mrf.mxu0  ;;  %v530_v55 = vpop.f32.mrf.mxu1 }
 0x16f   :  { %v802_v25 = vpop.eup %801 }
 0x170   :  { %v540_v56 = vadd.f32 1.0, %v802_v25 }
 0x172   :  { %803 = vrcp.f32 %v540_v56  ;;  %v552_v60 = vand.u32 2147483648, %v540_v56  ;;  %v550_v49 = vand.u32 2147483647, %v540_v56  ;;  %vm546_vm6 = vweird.f32 %v540_v56 }
 0x174   :  { %v553_v63 = vor.u32 1.1754944e-38, %v552_v60  ;;  %vm551_vm8 = vcmp.eq.f32.partialorder %v550_v49, 8.507059e+37 }
 0x178   :  { %v804_v57 = vpop.eup %803 }
 0x179   :  { %v542_v58 = vmul.f32 %v804_v57, %v540_v56  ;;  %vm547_vm5 = vweird.f32 %v804_v57 }
 0x17a   :  { %vm548_vm7 = vmor %vm546_vm6, %vm547_vm5 }
 0x17b   :  { %v543_v59 = vsub.f32 1.0, %v542_v58 }
 0x17d   :  { %v544_v61 = vmul.f32 %v804_v57, %v543_v59 }
 0x17f   :  { %v545_v62 = vadd.f32 %v804_v57, %v544_v61 }
 0x181   :  { %v549_v1 = vsel %vm548_vm7, %v804_v57, %v545_v62 }
 0x182   :  { %v554_v2 = vsel %vm551_vm8, %v553_v63, %v549_v1 }
 0x183   :  { %v556_v3 = vmul.f32 %v554_v2, %v536_v52 }
 0x185   :  { %v557_v4 = vpack.c.bf16 %v556_v3, %v556_v3 }
 0x187   :  { %634 = vmatmul.bf16.vlgmr.msra.gmra.mxu2 %v557_v4 }
 0x20a   :  { %v635_v7 = vpop.f32.mrf.mxu2 }
 0x20b   :  { %v636_v8 = vadd.f32 %v800_v5, %v635_v7 }
 0x20d   :  { %639 = vst [vmem:[#allocation7] sm:$0xff] %v636_v8 }
 0x20e   :  { %650 = dma.vmem_to_hbm [thread:$0]  %s646_s13, 128, %s648_s16, [#allocation4]  }
 0x212   :  { %v637_v9 = vpop.f32.mrf.mxu2 }
 0x213   :  { %881 = dma.done.wait [#allocation4], 128  }
 0x214   :  { %882 = vsyncadd [#allocation4], 4294967168 }
 0x215   :  { %655 = vsyncpa [#allocation3], 1 }
 0x216   :  { %656 = vsyncpa [#allocation6], 1 }
 0x217   :  { %657 = vsyncpa [#allocation4], 1 }

</bundles_post_ra>
